<compile_context>
chip_gen: v5e
topology: v5e:2x2
jax: 0.10.0
libtpu: 0.0.40
codegen_flags: <defaults>
</compile_context>

<pallas_src>
import math

import numpy as np
import jax
import jax.numpy as jnp
from jax.experimental import pallas as pl
from jax.experimental.pallas import tpu as pltpu


# ----------------------------------------------------------------------------
# Parameter (buffer) setup — plain JAX/numpy glue, deterministic.
# ----------------------------------------------------------------------------
def make_positional_encoding(d_model: int, max_len: int) -> jnp.ndarray:
    """Builds the (max_len, d_model) sinusoidal table exactly like the module."""
    position = np.arange(0, max_len, dtype=np.float32)[:, None]          # (L, 1)
    div_term = np.exp(
        np.arange(0, d_model, 2, dtype=np.float32) * (-math.log(10000.0) / d_model)
    )                                                                     # (D/2,)
    pe = np.zeros((max_len, d_model), dtype=np.float32)
    pe[:, 0::2] = np.sin(position * div_term)
    pe[:, 1::2] = np.cos(position * div_term)
    return jnp.asarray(pe)                                                # (L, D)


# ----------------------------------------------------------------------------
# Pallas kernels (operate on the flattened (rows, S*D) layout)
# ----------------------------------------------------------------------------
def _pe_add_kernel(x_ref, pe_ref, o_ref):
    # eval-mode forward: out = x + pe (dropout is identity in eval)
    o_ref[...] = x_ref[...] + pe_ref[...]         # (tb, tc) + (1, tc) broadcast


def _pe_add_dropout_kernel(x_ref, pe_ref, m_ref, o_ref):
    # training-mode forward: out = (x + pe) * mask, mask already holds
    # 0 or 1/(1-p) in x.dtype, so no dtype promotion / extra vreg pressure.
    o_ref[...] = (x_ref[...] + pe_ref[...]) * m_ref[...]


# ----------------------------------------------------------------------------
# Tiling heuristics
# ----------------------------------------------------------------------------
def _choose_tiles(batch, total_cols, itemsize, target_tile_bytes=2 * 1024 * 1024):
    """Pick (row_tile, col_tile): lane-dense columns, ~2 MiB per buffer."""
    tb = batch if batch <= 8 else 8               # divisible by 8 or == full dim
    tc = max(128, (target_tile_bytes // (tb * itemsize)) // 128 * 128)
    if total_cols % 128 != 0 or total_cols <= tc:
        tc = total_cols                           # full axis is always legal
    return int(tb), int(tc)


# ----------------------------------------------------------------------------
# Wrapper
# ----------------------------------------------------------------------------
def positional_encoding_forward(x, pe_table, *, p=0.1, training=False,
                                rng_key=None, donate_x=False):
    """x: (B, S, D); pe_table: (max_len, D).  Returns dropout(x + pe[:S])."""
    B, S, D = x.shape
    cols = S * D

    x2 = x.reshape(B, cols)                                    # free bitcast
    pe2 = pe_table[:S, :].astype(x.dtype).reshape(1, cols)     # (1, S*D)

    tb, tc = _choose_tiles(B, cols, jnp.dtype(x.dtype).itemsize)
    grid = (pl.cdiv(cols, tc), pl.cdiv(B, tb))     # col tiles outer, rows inner

    x_spec = pl.BlockSpec((tb, tc), lambda j, i: (i, j))
    pe_spec = pl.BlockSpec((1, tc), lambda j, i: (0, j))   # constant over inner
    o_spec = pl.BlockSpec((tb, tc), lambda j, i: (i, j))

    cparams = pltpu.CompilerParams(
        dimension_semantics=("parallel", "parallel"),
        vmem_limit_bytes=64 * 1024 * 1024,
    )
    out_shape = jax.ShapeDtypeStruct((B, cols), x.dtype)
    aliases = {0: 0} if donate_x else {}           # reuse x's HBM buffer if donated

    use_dropout = training and p > 0.0
    if not use_dropout:
        out2 = pl.pallas_call(
            _pe_add_kernel,
            out_shape=out_shape,
            grid=grid,
            in_specs=[x_spec, pe_spec],
            out_specs=o_spec,
            compiler_params=cparams,
            input_output_aliases=aliases,
        )(x2, pe2)
        return out2.reshape(B, S, D)

    # Training path: build the pre-scaled keep-mask outside the kernel.
    if rng_key is None:
        rng_key = jax.random.PRNGKey(0)
    keep = jax.random.bernoulli(rng_key, 1.0 - p, shape=(B, cols))
    scale = 0.0 if p >= 1.0 else 1.0 / (1.0 - p)   # p>=1: drop everything, no inf
    mask = keep.astype(x.dtype) * jnp.asarray(scale, dtype=x.dtype)

    out2 = pl.pallas_call(
        _pe_add_dropout_kernel,
        out_shape=out_shape,
        grid=grid,
        in_specs=[x_spec, pe_spec, x_spec],        # mask shares x's spec
        out_specs=o_spec,
        compiler_params=cparams,
        input_output_aliases=aliases,
    )(x2, pe2, mask)
    return out2.reshape(B, S, D)


# ----------------------------------------------------------------------------
# Demo / self-check
# ----------------------------------------------------------------------------
if __name__ == "__main__":
    batch, seq_len, d_model, max_len = 2, 8, 32, 64
    dropout_p = 0.1

    root = jax.random.PRNGKey(0)
    x_key, drop_key = jax.random.split(root)
    x = jax.random.normal(x_key, (batch, seq_len, d_model), dtype=jnp.float32)
    pe_table = make_positional_encoding(d_model, max_len)

    ref = np.asarray(x) + np.asarray(pe_table)[None, :seq_len, :]

    # Eval-mode (deterministic) path — must exactly match x + pe[:S].
    out_eval = positional_encoding_forward(x, pe_table, p=dropout_p, training=False)
    out_eval = jax.block_until_ready(out_eval)
    assert out_eval.shape == (batch, seq_len, d_model)
    assert np.allclose(np.asarray(out_eval), ref, rtol=1e-6, atol=1e-6)

    # Training-mode path (dropout): every element is either 0 (dropped) or
    # ref/(1-p) (kept).  RNG stream will not bit-match torch.
    out_train = positional_encoding_forward(
        x, pe_table, p=dropout_p, training=True, rng_key=drop_key)
    out_train = jax.block_until_ready(out_train)
    ot = np.asarray(out_train)
    scaled = ref / (1.0 - dropout_p)
    ok = np.isclose(ot, 0.0, atol=1e-6) | np.isclose(ot, scaled, rtol=1e-5, atol=1e-5)
    assert ok.all()

    print("KERNEL_OK")
</pallas_src>

<mosaic_0001>
module attributes {stable_mosaic.version = 11 : i64} {
  func.func @_pe_add_kernel(%arg0: i32, %arg1: i32, %arg2: memref<2x256xf32, #tpu.memory_space<vmem>>, %arg3: memref<1x256xf32, #tpu.memory_space<vmem>>, %arg4: memref<2x256xf32, #tpu.memory_space<vmem>>) attributes {dimension_semantics = [#tpu.dimension_semantics<parallel>, #tpu.dimension_semantics<parallel>], iteration_bounds = array<i64: 1, 1>, scalar_prefetch = 0 : i64, scratch_operands = 0 : i64, tpu.core_type = #tpu.core_type<tc>, window_params = [{transform_indices = @transform_0, window_bounds = array<i64: 2, 256>}, {transform_indices = @transform_1, window_bounds = array<i64: 1, 256>}, {transform_indices = @transform_2, window_bounds = array<i64: 2, 256>}]} {
    %c0 = arith.constant 0 : index
    %c0_0 = arith.constant 0 : index
    %0 = vector.load %arg2[%c0, %c0_0] : memref<2x256xf32, #tpu.memory_space<vmem>>, vector<2x256xf32>
    %c0_1 = arith.constant 0 : index
    %c0_2 = arith.constant 0 : index
    %1 = vector.load %arg3[%c0_1, %c0_2] : memref<1x256xf32, #tpu.memory_space<vmem>>, vector<1x256xf32>
    %2 = vector.broadcast %1 : vector<1x256xf32> to vector<2x256xf32>
    %3 = arith.addf %0, %2 : vector<2x256xf32>
    %c0_3 = arith.constant 0 : index
    %c0_4 = arith.constant 0 : index
    %4 = vector.load %arg4[%c0_3, %c0_4] : memref<2x256xf32, #tpu.memory_space<vmem>>, vector<2x256xf32>
    tpu.vector_store %arg4[%c0_3, %c0_4], %3 {strides = array<i32>} : memref<2x256xf32, #tpu.memory_space<vmem>>, vector<2x256xf32>,
    return
  }
  func.func @transform_0(%arg0: i32, %arg1: i32) -> (i32, i32) {
    %c0_i32 = arith.constant 0 : i32
    return %arg1, %arg0 : i32, i32
  }
  func.func @transform_1(%arg0: i32, %arg1: i32) -> (i32, i32) {
    %c0_i32 = arith.constant 0 : i32
    %c0_i32_0 = arith.constant 0 : i32
    return %c0_i32, %arg0 : i32, i32
  }
  func.func @transform_2(%arg0: i32, %arg1: i32) -> (i32, i32) {
    %c0_i32 = arith.constant 0 : i32
    return %arg1, %arg0 : i32, i32
  }
}

</mosaic_0001>

<bundles_post_ra>
// kernel: tpu_custom_call.1
= control target key start
LH: loop header
LB: loop body
LE: loop exit
PB: predicated region body
PF: predicated region fallthrough
CT: control target
= control target key end

     0   :  { %7 = vsyncpa [#allocation3], 0  ;;  %s177_s0 = inlined_call_operand.hbm [shape: f32[2,256], index: 0, kind: input, shape index: {}]   ;;  %s178_s1 = inlined_call_operand.hbm [shape: f32[1,256], index: 1, kind: input, shape index: {}]   ;;  %s179_s2 = inlined_call_operand.hbm [shape: f32[2,256], index: 2, kind: output, shape index: {}]  }
   0x1   :  { %8 = vsyncpa [#allocation6], 0 }
   0x2   :  { %9 = vsyncpa [#allocation4], 0  ;;  %s15_s11 = sshll.u32 %s177_s0, 4  ;;  %s150_s12 = smov [#allocation2]   ;;  %s16_s11 = int_to_ptr.hbm [resolvable:$true] %s15_s11 }
   0x3   :  { %s17_s13 = sshll.u32 %s150_s12, 4  ;;  %s26_s16 = sshll.u32 %s178_s1, 4  ;;  %s18_s13 = int_to_ptr.vmem [resolvable:$true] %s17_s13  ;;  %s27_s16 = int_to_ptr.hbm [resolvable:$true] %s26_s16 }
   0x4   :  { %20 = dma.hbm_to_vmem [thread:$0]  %s16_s11, 64, %s18_s13, [#allocation3]  }
   0x5   :  { %s151_s17 = smov [#allocation5]  }
   0x6   :  { %s28_s18 = sshll.u32 %s151_s17, 4  ;;  %s29_s18 = int_to_ptr.vmem [resolvable:$true] %s28_s18 }
   0x7   :  { %31 = dma.hbm_to_vmem [thread:$0]  %s27_s16, 32, %s29_s18, [#allocation6]  }
   0x8   :  { %144 = dma.done.wait [#allocation3], 64  }
   0x9   :  { %145 = vsyncadd [#allocation3], 4294967232 }
   0xa   :  { %146 = dma.done.wait [#allocation6], 32  }
   0xb   :  { %147 = vsyncadd [#allocation6], 4294967264  ;;  %v41_v0 = vld [vmem:[#allocation5] sm:$0x3]  ;;  %vm46_vm0 = vcmask 1041408   ;;  %s152_s0 = smov [#allocation7]  }
   0xc   :  { %v43_v1 = vperm.slane %v41_v0, 0  ;;  %v44_v2 = vperm.slane %v41_v0, 1  ;;  %v40_v3 = vld [vmem:[#allocation2] sm:$0xf]  ;;  %s56_s19 = sshll.u32 %s152_s0, 4  ;;  %s58_s21 = sshll.u32 %s179_s2, 4  ;;  %s57_s19 = int_to_ptr.vmem [resolvable:$true] %s56_s19  ;;  %s59_s21 = int_to_ptr.hbm [resolvable:$true] %s58_s21 }
   0xe   :  { %v45_v4 = vrot.slane %v44_v2, 6 }
  0x10   :  { %v47_v5 = vsel %vm46_vm0, %v43_v1, %v45_v4 }
  0x11   :  { %v49_v6 = vadd.f32 %v47_v5, %v40_v3 }
  0x13   :  { %50 = vst [vmem:[#allocation7] sm:$0xf] %v49_v6 }
  0x14   :  { %61 = dma.vmem_to_hbm [thread:$0]  %s57_s19, 64, %s59_s21, [#allocation4]  }
  0x15   :  { %148 = dma.done.wait [#allocation4], 64  }
  0x16   :  { %149 = vsyncadd [#allocation4], 4294967232 }
  0x17   :  { %66 = vsyncpa [#allocation3], 1 }
  0x18   :  { %67 = vsyncpa [#allocation6], 1 }
  0x19   :  { %68 = vsyncpa [#allocation4], 1 }

</bundles_post_ra>
